<compile_context>
chip_gen: v7x
topology: tpu7x:2x2x1
jax: 0.10.0
libtpu: 0.0.40
codegen_flags: <defaults>
</compile_context>

<pallas_src>
import functools

import jax
import jax.numpy as jnp
from jax.experimental import pallas as pl
from jax.experimental.pallas import tpu as pltpu

_EPS = 1e-5  # PyTorch default eps for InstanceNorm1d / BatchNorm1d.


def _gated_conv_block_kernel(*args, kernel_size, pad_left, with_instance_norm):
    """Fused [InstanceNorm1d] + ConstantPad1d + Conv1d + GLU + BN(eval) + ReLU.

    Ref shapes (batch dim squeezed away by the BlockSpecs, NCL layout):
      x_ref:        (C_in, L)          input slab (L on lanes)
      in_g/in_b:    (C_in, 1)          InstanceNorm1d affine (stage 1 only)
      w_ref:        (2H, K*C_in)       conv weight, tap-major flattened
      b_ref:        (2H, 1)            conv bias
      scale/shift:  (H, 1)             eval BatchNorm1d folded to affine
      o_ref:        (H, L)             output slab
      stacked_ref:  (K*C_in, L) VMEM   im2col scratch
    """
    if with_instance_norm:
        (x_ref, in_g_ref, in_b_ref, w_ref, b_ref, scale_ref, shift_ref,
         o_ref, stacked_ref) = args
    else:
        (x_ref, w_ref, b_ref, scale_ref, shift_ref, o_ref, stacked_ref) = args

    x = x_ref[...]                                # (C_in, L) f32
    c_in, length = x.shape

    if with_instance_norm:
        mu = jnp.mean(x, axis=-1, keepdims=True)
        xc = x - mu
        var = jnp.mean(xc * xc, axis=-1, keepdims=True)
        x = xc * jax.lax.rsqrt(var + _EPS) * in_g_ref[...] + in_b_ref[...]

    # In-kernel zero-padded im2col into VMEM scratch:
    #   stacked[t*C_in + ci, l] = x[ci, l + t - pad_left], zero outside [0, L).
    # This replaces the wrapper-side ConstantPad1d (no extra HBM pass).
    stacked_ref[...] = jnp.zeros_like(stacked_ref)
    for t in range(kernel_size):                  # static, unrolled over taps
        s = t - pad_left
        width = length - abs(s)
        if width > 0:
            src_lo = max(0, s)
            dst_lo = max(0, -s)
            stacked_ref[t * c_in:(t + 1) * c_in, dst_lo:dst_lo + width] = (
                x[:, src_lo:src_lo + width])

    # Single fused MXU matmul over the K*C_in contraction, f32 accumulation.
    conv = jnp.dot(w_ref[...], stacked_ref[...],
                   preferred_element_type=jnp.float32) + b_ref[...]

    half = conv.shape[0] // 2
    gate = 1.0 / (1.0 + jnp.exp(-conv[half:, :]))          # sigmoid (EUP exp)
    glu = conv[:half, :] * gate                            # GLU(dim=-2)
    y = glu * scale_ref[...] + shift_ref[...]              # eval BatchNorm1d
    o_ref[...] = jnp.maximum(y, 0.0).astype(o_ref.dtype)   # ReLU


def _gated_conv_block(x, conv_w, conv_b, bn_gamma, bn_beta, bn_mean, bn_var,
                      *, kernel_size, instance_norm=None):
    """One GatedConv stage on NCL input: (B, C_in, L) -> (B, H, L)."""
    batch, c_in, length = x.shape
    c_out2 = conv_w.shape[0]              # = 2 * H
    half = c_out2 // 2
    pad_left = (kernel_size - 1) // 2

    # (2H, C_in, K) -> (2H, K, C_in) -> (2H, K*C_in); matches the tap-major
    # row order of the in-kernel im2col scratch.  (One-time weight prep.)
    w_flat = jnp.transpose(conv_w, (0, 2, 1)).reshape(
        c_out2, kernel_size * c_in).astype(jnp.float32)
    bias2d = conv_b.reshape(c_out2, 1).astype(jnp.float32)

    # Fold eval-mode BatchNorm1d into a single per-channel affine.
    inv_std = 1.0 / jnp.sqrt(bn_var + _EPS)
    bn_scale = (bn_gamma * inv_std).reshape(half, 1).astype(jnp.float32)
    bn_shift = (bn_beta - bn_mean * bn_gamma * inv_std).reshape(
        half, 1).astype(jnp.float32)

    with_in = instance_norm is not None
    kernel = functools.partial(
        _gated_conv_block_kernel,
        kernel_size=kernel_size,
        pad_left=pad_left,
        with_instance_norm=with_in,
    )

    operands = [x.astype(jnp.float32)]
    in_specs = [pl.BlockSpec((None, c_in, length), lambda b: (b, 0, 0))]
    if with_in:
        in_gamma, in_beta = instance_norm
        operands += [in_gamma.reshape(c_in, 1).astype(jnp.float32),
                     in_beta.reshape(c_in, 1).astype(jnp.float32)]
        in_specs += [pl.BlockSpec((c_in, 1), lambda b: (0, 0)),
                     pl.BlockSpec((c_in, 1), lambda b: (0, 0))]
    operands += [w_flat, bias2d, bn_scale, bn_shift]
    in_specs += [
        pl.BlockSpec((c_out2, kernel_size * c_in), lambda b: (0, 0)),
        pl.BlockSpec((c_out2, 1), lambda b: (0, 0)),
        pl.BlockSpec((half, 1), lambda b: (0, 0)),
        pl.BlockSpec((half, 1), lambda b: (0, 0)),
    ]

    return pl.pallas_call(
        kernel,
        out_shape=jax.ShapeDtypeStruct((batch, half, length), jnp.float32),
        grid_spec=pltpu.PrefetchScalarGridSpec(
            num_scalar_prefetch=0,
            grid=(batch,),
            in_specs=in_specs,
            out_specs=pl.BlockSpec((None, half, length), lambda b: (b, 0, 0)),
            scratch_shapes=[
                pltpu.VMEM((kernel_size * c_in, length), jnp.float32),
            ],
        ),
        compiler_params=pltpu.CompilerParams(
            dimension_semantics=("parallel",),
        ),
    )(*operands)


def gated_conv_forward(x, params, *, kernel_sizes=(8, 5, 3)):
    """Eval-mode GatedConv forward.  x: (B, N, L) NCL  ->  (B, h3)."""
    batch, n_ch, length = x.shape
    assert length % 32 == 0, "L must divide by 32 for the pooling chain."

    # downsample0 = AvgPool1d(2)  (cheap glue, stays in XLA)
    x = x.reshape(batch, n_ch, length // 2, 2).mean(axis=-1)

    # Stage 1: InstanceNorm1d + pad1 + conv1 + GLU + bn1 + ReLU (fused Pallas)
    x = _gated_conv_block(
        x, params["conv1_w"], params["conv1_b"],
        params["bn1_gamma"], params["bn1_beta"],
        params["bn1_mean"], params["bn1_var"],
        kernel_size=kernel_sizes[0],
        instance_norm=(params["in0_gamma"], params["in0_beta"]))
    # F.max_pool1d(x, 4); Dropout1d(p=0.1) is identity in eval mode.
    b, c, l = x.shape
    x = x.reshape(b, c, l // 4, 4).max(axis=-1)

    # Stage 2: pad2 + conv2 + GLU + bn2 + ReLU (fused Pallas)
    x = _gated_conv_block(
        x, params["conv2_w"], params["conv2_b"],
        params["bn2_gamma"], params["bn2_beta"],
        params["bn2_mean"], params["bn2_var"],
        kernel_size=kernel_sizes[1])
    b, c, l = x.shape
    x = x.reshape(b, c, l // 4, 4).max(axis=-1)

    # Stage 3: pad3 + conv3 + GLU + bn3 + ReLU (fused Pallas)
    x = _gated_conv_block(
        x, params["conv3_w"], params["conv3_b"],
        params["bn3_gamma"], params["bn3_beta"],
        params["bn3_mean"], params["bn3_var"],
        kernel_size=kernel_sizes[2])

    # averagepool = AvgPool1d(L // 32) over the remaining L//32 samples,
    # then squeeze(-1): equivalent to a mean over the time axis.
    return x.mean(axis=-1)


def _reference_forward(x, params, *, kernel_sizes=(8, 5, 3)):
    """Pure-JAX reference (matches the torch module in eval mode)."""
    batch, n_ch, length = x.shape
    x = x.reshape(batch, n_ch, length // 2, 2).mean(axis=-1)

    # InstanceNorm1d(affine=True): per-(sample, channel) stats over time.
    mu = x.mean(axis=-1, keepdims=True)
    var = ((x - mu) ** 2).mean(axis=-1, keepdims=True)
    x = (x - mu) / jnp.sqrt(var + _EPS)
    x = x * params["in0_gamma"][None, :, None] + params["in0_beta"][None, :, None]

    def stage(x, w, bvec, gamma, beta, mean, var_, k):
        pad_l, pad_r = (k - 1) // 2, k // 2
        xp = jnp.pad(x, ((0, 0), (0, 0), (pad_l, pad_r)))
        y = jax.lax.conv_general_dilated(
            xp, w, window_strides=(1,), padding="VALID",
            dimension_numbers=("NCH", "OIH", "NCH"),
            precision=jax.lax.Precision.HIGHEST)
        y = y + bvec[None, :, None]
        h = w.shape[0] // 2
        y = y[:, :h, :] * jax.nn.sigmoid(y[:, h:, :])             # GLU(dim=-2)
        y = (y - mean[None, :, None]) / jnp.sqrt(var_[None, :, None] + _EPS)
        y = y * gamma[None, :, None] + beta[None, :, None]        # BN eval
        return jnp.maximum(y, 0.0)

    x = stage(x, params["conv1_w"], params["conv1_b"], params["bn1_gamma"],
              params["bn1_beta"], params["bn1_mean"], params["bn1_var"],
              kernel_sizes[0])
    b, c, l = x.shape
    x = x.reshape(b, c, l // 4, 4).max(axis=-1)
    x = stage(x, params["conv2_w"], params["conv2_b"], params["bn2_gamma"],
              params["bn2_beta"], params["bn2_mean"], params["bn2_var"],
              kernel_sizes[1])
    b, c, l = x.shape
    x = x.reshape(b, c, l // 4, 4).max(axis=-1)
    x = stage(x, params["conv3_w"], params["conv3_b"], params["bn3_gamma"],
              params["bn3_beta"], params["bn3_mean"], params["bn3_var"],
              kernel_sizes[2])
    return x.mean(axis=-1)


if __name__ == "__main__":
    # Small config: input_shape (N, L) = (4, 64), hidden_size = 32,
    # kernel_sizes = [8, 5, 3]  ->  h1 = 32, h2 = h3 = 64, output (B, 64).
    batch, n_ch, length = 2, 4, 64
    hidden = 32
    kernel_sizes = (8, 5, 3)
    h1, h2, h3 = hidden, hidden * 2, hidden * 2

    keys = iter(jax.random.split(jax.random.PRNGKey(0), 24))

    def nrm(shape, scale=1.0):
        return scale * jax.random.normal(next(keys), shape, dtype=jnp.float32)

    def unif(shape, lo, hi):
        return jax.random.uniform(next(keys), shape, jnp.float32, lo, hi)

    x = nrm((batch, n_ch, length))
    params = {
        "in0_gamma": 1.0 + nrm((n_ch,), 0.1),
        "in0_beta": nrm((n_ch,), 0.1),
        "conv1_w": nrm((2 * h1, n_ch, kernel_sizes[0]), 0.1),
        "conv1_b": nrm((2 * h1,), 0.1),
        "bn1_gamma": 1.0 + nrm((h1,), 0.1),
        "bn1_beta": nrm((h1,), 0.1),
        "bn1_mean": nrm((h1,), 0.1),
        "bn1_var": unif((h1,), 0.5, 1.5),
        "conv2_w": nrm((2 * h2, h1, kernel_sizes[1]), 0.05),
        "conv2_b": nrm((2 * h2,), 0.1),
        "bn2_gamma": 1.0 + nrm((h2,), 0.1),
        "bn2_beta": nrm((h2,), 0.1),
        "bn2_mean": nrm((h2,), 0.1),
        "bn2_var": unif((h2,), 0.5, 1.5),
        "conv3_w": nrm((2 * h3, h2, kernel_sizes[2]), 0.05),
        "conv3_b": nrm((2 * h3,), 0.1),
        "bn3_gamma": 1.0 + nrm((h3,), 0.1),
        "bn3_beta": nrm((h3,), 0.1),
        "bn3_mean": nrm((h3,), 0.1),
        "bn3_var": unif((h3,), 0.5, 1.5),
    }

    out = gated_conv_forward(x, params, kernel_sizes=kernel_sizes)
    out = jax.block_until_ready(out)

    ref = _reference_forward(x, params, kernel_sizes=kernel_sizes)
    ref = jax.block_until_ready(ref)

    assert out.shape == (batch, h3), out.shape
    assert jnp.allclose(out, ref, atol=2e-4, rtol=2e-4), (
        "max |diff| = %g" % float(jnp.max(jnp.abs(out - ref))))

    print("KERNEL_OK")
</pallas_src>

<mosaic_0001>
module attributes {stable_mosaic.version = 11 : i64} {
  func.func @_gated_conv_block_kernel(%arg0: i32, %arg1: memref<1x4x32xf32, #tpu.memory_space<vmem>>, %arg2: memref<4x1xf32, #tpu.memory_space<vmem>>, %arg3: memref<4x1xf32, #tpu.memory_space<vmem>>, %arg4: memref<64x32xf32, #tpu.memory_space<vmem>>, %arg5: memref<64x1xf32, #tpu.memory_space<vmem>>, %arg6: memref<32x1xf32, #tpu.memory_space<vmem>>, %arg7: memref<32x1xf32, #tpu.memory_space<vmem>>, %arg8: memref<1x32x32xf32, #tpu.memory_space<vmem>>, %arg9: memref<32x32xf32, #tpu.memory_space<vmem>>) attributes {dimension_semantics = [#tpu.dimension_semantics<parallel>], iteration_bounds = array<i64: 2>, scalar_prefetch = 0 : i64, scratch_operands = 1 : i64, tpu.core_type = #tpu.core_type<tc>, window_params = [{transform_indices = @transform_0, window_bounds = array<i64: 1, 4, 32>}, {pipeline_mode = #tpu.pipeline_mode<synchronous>, transform_indices = @transform_1, window_bounds = array<i64: 4, 1>}, {pipeline_mode = #tpu.pipeline_mode<synchronous>, transform_indices = @transform_2, window_bounds = array<i64: 4, 1>}, {pipeline_mode = #tpu.pipeline_mode<synchronous>, transform_indices = @transform_3, window_bounds = array<i64: 64, 32>}, {pipeline_mode = #tpu.pipeline_mode<synchronous>, transform_indices = @transform_4, window_bounds = array<i64: 64, 1>}, {pipeline_mode = #tpu.pipeline_mode<synchronous>, transform_indices = @transform_5, window_bounds = array<i64: 32, 1>}, {pipeline_mode = #tpu.pipeline_mode<synchronous>, transform_indices = @transform_6, window_bounds = array<i64: 32, 1>}, {transform_indices = @transform_7, window_bounds = array<i64: 1, 32, 32>}]} {
    %c0 = arith.constant 0 : index
    %c0_0 = arith.constant 0 : index
    %c0_1 = arith.constant 0 : index
    %0 = vector.load %arg1[%c0, %c0_0, %c0_1] : memref<1x4x32xf32, #tpu.memory_space<vmem>>, vector<1x4x32xf32>
    %1 = vector.shape_cast %0 : vector<1x4x32xf32> to vector<4x32xf32>
    %cst = arith.constant dense<0.000000e+00> : vector<4xf32>
    %2 = vector.multi_reduction <add>, %1, %cst [1] : vector<4x32xf32> to vector<4xf32>
    %3 = vector.shape_cast %2 : vector<4xf32> to vector<4x1xf32>
    %cst_2 = arith.constant 3.200000e+01 : f32
    %4 = vector.broadcast %cst_2 : f32 to vector<4x1xf32>
    %5 = arith.divf %3, %4 : vector<4x1xf32>
    %6 = vector.broadcast %5 : vector<4x1xf32> to vector<4x32xf32>
    %7 = arith.subf %1, %6 : vector<4x32xf32>
    %8 = arith.mulf %7, %7 : vector<4x32xf32>
    %cst_3 = arith.constant dense<0.000000e+00> : vector<4xf32>
    %9 = vector.multi_reduction <add>, %8, %cst_3 [1] : vector<4x32xf32> to vector<4xf32>
    %10 = vector.shape_cast %9 : vector<4xf32> to vector<4x1xf32>
    %cst_4 = arith.constant 3.200000e+01 : f32
    %11 = vector.broadcast %cst_4 : f32 to vector<4x1xf32>
    %12 = arith.divf %10, %11 : vector<4x1xf32>
    %cst_5 = arith.constant 9.99999974E-6 : f32
    %13 = vector.broadcast %cst_5 : f32 to vector<4x1xf32>
    %14 = arith.addf %12, %13 : vector<4x1xf32>
    %15 = math.rsqrt %14 : vector<4x1xf32>
    %16 = vector.broadcast %15 : vector<4x1xf32> to vector<4x32xf32>
    %17 = arith.mulf %7, %16 : vector<4x32xf32>
    %c0_6 = arith.constant 0 : index
    %c0_7 = arith.constant 0 : index
    %18 = vector.load %arg2[%c0_6, %c0_7] : memref<4x1xf32, #tpu.memory_space<vmem>>, vector<4x1xf32>
    %19 = vector.broadcast %18 : vector<4x1xf32> to vector<4x32xf32>
    %20 = arith.mulf %17, %19 : vector<4x32xf32>
    %c0_8 = arith.constant 0 : index
    %c0_9 = arith.constant 0 : index
    %21 = vector.load %arg3[%c0_8, %c0_9] : memref<4x1xf32, #tpu.memory_space<vmem>>, vector<4x1xf32>
    %22 = vector.broadcast %21 : vector<4x1xf32> to vector<4x32xf32>
    %23 = arith.addf %20, %22 : vector<4x32xf32>
    %cst_10 = arith.constant 0.000000e+00 : f32
    %24 = vector.broadcast %cst_10 : f32 to vector<32x32xf32>
    %c0_11 = arith.constant 0 : index
    %c0_12 = arith.constant 0 : index
    %25 = vector.load %arg9[%c0_11, %c0_12] : memref<32x32xf32, #tpu.memory_space<vmem>>, vector<32x32xf32>
    tpu.vector_store %arg9[%c0_11, %c0_12], %24 {strides = array<i32>} : memref<32x32xf32, #tpu.memory_space<vmem>>, vector<32x32xf32>,
    %26 = vector.extract_strided_slice %23 {offsets = [0, 0], sizes = [4, 29], strides = [1, 1]} : vector<4x32xf32> to vector<4x29xf32>
    %c0_13 = arith.constant 0 : index
    %c3 = arith.constant 3 : index
    %27 = vector.load %arg9[%c0_13, %c3] : memref<32x32xf32, #tpu.memory_space<vmem>>, vector<4x29xf32>
    tpu.vector_store %arg9[%c0_13, %c3], %26 {strides = array<i32>} : memref<32x32xf32, #tpu.memory_space<vmem>>, vector<4x29xf32>,
    %28 = vector.extract_strided_slice %23 {offsets = [0, 0], sizes = [4, 30], strides = [1, 1]} : vector<4x32xf32> to vector<4x30xf32>
    %c4 = arith.constant 4 : index
    %c2 = arith.constant 2 : index
    %29 = vector.load %arg9[%c4, %c2] : memref<32x32xf32, #tpu.memory_space<vmem>>, vector<4x30xf32>
    tpu.vector_store %arg9[%c4, %c2], %28 {strides = array<i32>} : memref<32x32xf32, #tpu.memory_space<vmem>>, vector<4x30xf32>,
    %30 = vector.extract_strided_slice %23 {offsets = [0, 0], sizes = [4, 31], strides = [1, 1]} : vector<4x32xf32> to vector<4x31xf32>
    %c8 = arith.constant 8 : index
    %c1 = arith.constant 1 : index
    %31 = vector.load %arg9[%c8, %c1] : memref<32x32xf32, #tpu.memory_space<vmem>>, vector<4x31xf32>
    tpu.vector_store %arg9[%c8, %c1], %30 {strides = array<i32>} : memref<32x32xf32, #tpu.memory_space<vmem>>, vector<4x31xf32>,
    %c12 = arith.constant 12 : index
    %c0_14 = arith.constant 0 : index
    %32 = vector.load %arg9[%c12, %c0_14] : memref<32x32xf32, #tpu.memory_space<vmem>>, vector<4x32xf32>
    tpu.vector_store %arg9[%c12, %c0_14], %23 {strides = array<i32>} : memref<32x32xf32, #tpu.memory_space<vmem>>, vector<4x32xf32>,
    %33 = vector.extract_strided_slice %23 {offsets = [0, 1], sizes = [4, 31], strides = [1, 1]} : vector<4x32xf32> to vector<4x31xf32>
    %c16 = arith.constant 16 : index
    %c0_15 = arith.constant 0 : index
    %34 = vector.load %arg9[%c16, %c0_15] : memref<32x32xf32, #tpu.memory_space<vmem>>, vector<4x31xf32>
    tpu.vector_store %arg9[%c16, %c0_15], %33 {strides = array<i32>} : memref<32x32xf32, #tpu.memory_space<vmem>>, vector<4x31xf32>,
    %35 = vector.extract_strided_slice %23 {offsets = [0, 2], sizes = [4, 30], strides = [1, 1]} : vector<4x32xf32> to vector<4x30xf32>
    %c20 = arith.constant 20 : index
    %c0_16 = arith.constant 0 : index
    %36 = vector.load %arg9[%c20, %c0_16] : memref<32x32xf32, #tpu.memory_space<vmem>>, vector<4x30xf32>
    tpu.vector_store %arg9[%c20, %c0_16], %35 {strides = array<i32>} : memref<32x32xf32, #tpu.memory_space<vmem>>, vector<4x30xf32>,
    %37 = vector.extract_strided_slice %23 {offsets = [0, 3], sizes = [4, 29], strides = [1, 1]} : vector<4x32xf32> to vector<4x29xf32>
    %c24 = arith.constant 24 : index
    %c0_17 = arith.constant 0 : index
    %38 = vector.load %arg9[%c24, %c0_17] : memref<32x32xf32, #tpu.memory_space<vmem>>, vector<4x29xf32>
    tpu.vector_store %arg9[%c24, %c0_17], %37 {strides = array<i32>} : memref<32x32xf32, #tpu.memory_space<vmem>>, vector<4x29xf32>,
    %39 = vector.extract_strided_slice %23 {offsets = [0, 4], sizes = [4, 28], strides = [1, 1]} : vector<4x32xf32> to vector<4x28xf32>
    %c28 = arith.constant 28 : index
    %c0_18 = arith.constant 0 : index
    %40 = vector.load %arg9[%c28, %c0_18] : memref<32x32xf32, #tpu.memory_space<vmem>>, vector<4x28xf32>
    tpu.vector_store %arg9[%c28, %c0_18], %39 {strides = array<i32>} : memref<32x32xf32, #tpu.memory_space<vmem>>, vector<4x28xf32>,
    %c0_19 = arith.constant 0 : index
    %c0_20 = arith.constant 0 : index
    %41 = vector.load %arg4[%c0_19, %c0_20] : memref<64x32xf32, #tpu.memory_space<vmem>>, vector<64x32xf32>
    %c0_21 = arith.constant 0 : index
    %c0_22 = arith.constant 0 : index
    %42 = vector.load %arg9[%c0_21, %c0_22] : memref<32x32xf32, #tpu.memory_space<vmem>>, vector<32x32xf32>
    %cst_23 = arith.constant dense<0.000000e+00> : vector<64x32xf32>
    %43 = tpu.matmul %41, %42, %cst_23 {dimension_numbers = #tpu.dot_dimension_numbers<[1], [0], [0], [1], [0, 0, 1, 1], [], []>} : vector<64x32xf32>, vector<32x32xf32>, vector<64x32xf32> -> vector<64x32xf32>
    %c0_24 = arith.constant 0 : index
    %c0_25 = arith.constant 0 : index
    %44 = vector.load %arg5[%c0_24, %c0_25] : memref<64x1xf32, #tpu.memory_space<vmem>>, vector<64x1xf32>
    %45 = vector.broadcast %44 : vector<64x1xf32> to vector<64x32xf32>
    %46 = arith.addf %43, %45 : vector<64x32xf32>
    %47 = vector.extract_strided_slice %46 {offsets = [32, 0], sizes = [32, 32], strides = [1, 1]} : vector<64x32xf32> to vector<32x32xf32>
    %cst_26 = arith.constant 0.000000e+00 : f32
    %48 = vector.broadcast %cst_26 : f32 to vector<32x32xf32>
    %49 = arith.subf %48, %47 : vector<32x32xf32>
    %50 = math.exp %49 : vector<32x32xf32>
    %cst_27 = arith.constant 1.000000e+00 : f32
    %51 = vector.broadcast %cst_27 : f32 to vector<32x32xf32>
    %52 = arith.addf %51, %50 : vector<32x32xf32>
    %cst_28 = arith.constant 1.000000e+00 : f32
    %53 = vector.broadcast %cst_28 : f32 to vector<32x32xf32>
    %54 = arith.divf %53, %52 : vector<32x32xf32>
    %55 = vector.extract_strided_slice %46 {offsets = [0, 0], sizes = [32, 32], strides = [1, 1]} : vector<64x32xf32> to vector<32x32xf32>
    %56 = arith.mulf %55, %54 : vector<32x32xf32>
    %c0_29 = arith.constant 0 : index
    %c0_30 = arith.constant 0 : index
    %57 = vector.load %arg6[%c0_29, %c0_30] : memref<32x1xf32, #tpu.memory_space<vmem>>, vector<32x1xf32>
    %58 = vector.broadcast %57 : vector<32x1xf32> to vector<32x32xf32>
    %59 = arith.mulf %56, %58 : vector<32x32xf32>
    %c0_31 = arith.constant 0 : index
    %c0_32 = arith.constant 0 : index
    %60 = vector.load %arg7[%c0_31, %c0_32] : memref<32x1xf32, #tpu.memory_space<vmem>>, vector<32x1xf32>
    %61 = vector.broadcast %60 : vector<32x1xf32> to vector<32x32xf32>
    %62 = arith.addf %59, %61 : vector<32x32xf32>
    %cst_33 = arith.constant 0.000000e+00 : f32
    %63 = vector.broadcast %cst_33 : f32 to vector<32x32xf32>
    %64 = arith.maximumf %62, %63 : vector<32x32xf32>
    %c0_34 = arith.constant 0 : index
    %c0_35 = arith.constant 0 : index
    %c0_36 = arith.constant 0 : index
    %65 = vector.load %arg8[%c0_34, %c0_35, %c0_36] : memref<1x32x32xf32, #tpu.memory_space<vmem>>, vector<1x32x32xf32>
    %66 = vector.shape_cast %65 : vector<1x32x32xf32> to vector<32x32xf32>
    %67 = vector.shape_cast %64 : vector<32x32xf32> to vector<1x32x32xf32>
    tpu.vector_store %arg8[%c0_34, %c0_35, %c0_36], %67 {strides = array<i32>} : memref<1x32x32xf32, #tpu.memory_space<vmem>>, vector<1x32x32xf32>,
    return
  }
  func.func @transform_0(%arg0: i32) -> (i32, i32, i32) {
    %c0_i32 = arith.constant 0 : i32
    %c0_i32_0 = arith.constant 0 : i32
    %c0_i32_1 = arith.constant 0 : i32
    return %arg0, %c0_i32, %c0_i32_0 : i32, i32, i32
  }
  func.func @transform_1(%arg0: i32) -> (i32, i32) {
    %c0_i32 = arith.constant 0 : i32
    %c0_i32_0 = arith.constant 0 : i32
    %c0_i32_1 = arith.constant 0 : i32
    return %c0_i32, %c0_i32_0 : i32, i32
  }
  func.func @transform_2(%arg0: i32) -> (i32, i32) {
    %c0_i32 = arith.constant 0 : i32
    %c0_i32_0 = arith.constant 0 : i32
    %c0_i32_1 = arith.constant 0 : i32
    return %c0_i32, %c0_i32_0 : i32, i32
  }
  func.func @transform_3(%arg0: i32) -> (i32, i32) {
    %c0_i32 = arith.constant 0 : i32
    %c0_i32_0 = arith.constant 0 : i32
    %c0_i32_1 = arith.constant 0 : i32
    return %c0_i32, %c0_i32_0 : i32, i32
  }
  func.func @transform_4(%arg0: i32) -> (i32, i32) {
    %c0_i32 = arith.constant 0 : i32
    %c0_i32_0 = arith.constant 0 : i32
    %c0_i32_1 = arith.constant 0 : i32
    return %c0_i32, %c0_i32_0 : i32, i32
  }
  func.func @transform_5(%arg0: i32) -> (i32, i32) {
    %c0_i32 = arith.constant 0 : i32
    %c0_i32_0 = arith.constant 0 : i32
    %c0_i32_1 = arith.constant 0 : i32
    return %c0_i32, %c0_i32_0 : i32, i32
  }
  func.func @transform_6(%arg0: i32) -> (i32, i32) {
    %c0_i32 = arith.constant 0 : i32
    %c0_i32_0 = arith.constant 0 : i32
    %c0_i32_1 = arith.constant 0 : i32
    return %c0_i32, %c0_i32_0 : i32, i32
  }
  func.func @transform_7(%arg0: i32) -> (i32, i32, i32) {
    %c0_i32 = arith.constant 0 : i32
    %c0_i32_0 = arith.constant 0 : i32
    %c0_i32_1 = arith.constant 0 : i32
    return %arg0, %c0_i32, %c0_i32_0 : i32, i32, i32
  }
}

</mosaic_0001>

<bundles_post_ra>
// kernel: tpu_custom_call.1
= control target key start
LH: loop header
LB: loop body
LE: loop exit
PB: predicated region body
PF: predicated region fallthrough
CT: control target
= control target key end

     0   :  { %12 = vsyncpa [#allocation4], 0  ;;  %s1157_s0 = inlined_call_operand.vmem [shape: f32[2,4,32], index: 0, kind: input, shape index: {}]   ;;  %s1158_s1 = inlined_call_operand.vmem [shape: f32[4,1], index: 1, kind: input, shape index: {}]   ;;  %s1159_s2 = inlined_call_operand.vmem [shape: f32[4,1], index: 2, kind: input, shape index: {}]   ;;  %s1160_s3 = inlined_call_operand.vmem [shape: f32[64,32], index: 3, kind: input, shape index: {}]   ;;  %s1161_s4 = inlined_call_operand.vmem [shape: f32[64,1], index: 4, kind: input, shape index: {}]   ;;  %s1162_s5 = inlined_call_operand.vmem [shape: f32[32,1], index: 5, kind: input, shape index: {}]   ;;  %s1163_s6 = inlined_call_operand.vmem [shape: f32[32,1], index: 6, kind: input, shape index: {}]   ;;  %s1164_s7 = inlined_call_operand.hbm [shape: f32[2,32,32], index: 7, kind: output, shape index: {}]  }
   0x1   :  { %14 = vsyncpa [#allocation4 + $0x1], 0  ;;  %s953_s24 = smov 0   ;;  %s955_s25 = smov 0  }
   0x2   :  { %s957_s26 = smov 0   ;;  %s959_s27 = smov 0  }
   0x3 LB: > { %s974_s28 = sadd.s32 4294967295, %s899_s27   ;;  %s703_s29 = sadd.s32 4294967294, %s899_s27   ;;  %s899_s27 = sphi %s959_s27, %s1170_s27   ;;  %s895_s26 = sphi %s957_s26, %s1169_s26   ;;  %s891_s25 = sphi %s955_s25, %s1168_s25   ;;  %s887_s24 = sphi %s953_s24, %s1167_s24  }
   0x4   : > { %s978_s30 = sadd.s32 1, %s899_s27   ;;  %s179_s8 = sadd.s32 1, %s895_s26 }
   0x5   : > { %s176_s9 = ssub.s32 %s899_s27, %s978_s30  ;;  %p189_p0 = scmp.ne.s32.totalorder %s895_s26, %s891_s25 }
   0x6   : > { %p177_p1 = scmp.eq.s32.totalorder %s176_s9, 0  ;;  %p190_p2 = scmp.eq.s32.totalorder %s974_s28, 1 }
   0x7   : > { %p195_p3 = scmp.ne.s32.totalorder %s891_s25, %s887_s24  ;;  %p196_p4 = scmp.eq.s32.totalorder %s703_s29, 1 }
   0x8   : > { %s989_s10 = scalar_select %p177_p1, %s895_s26, %s179_s8  }
   0x9   : > { %p991_p5 = por %p190_p2, %p189_p0  ;;  %p995_p6 = por %p196_p4, %p195_p3 }
   0xa   : > { %p706_p7 = scmp.ge.s32.totalorder %s899_s27, 1  ;;  %p239_p8 = scmp.lt.s32.totalorder %s899_s27, 3 }
   0xc   : > { %p240_p9 = pnand %p706_p7, %p239_p8 }
   0xd   : > { %p270_p10 = scmp.lt.s32.totalorder (!%p240_p9), %s974_s28, 1  ;;  %vm275_vm0 = vcmask (!%p240_p9), 257024   ;;  %v290_v2 = vld [vmem:[%s1158_s1] sm:$0xf] (!%p240_p9)  ;;  %v901_v3 = vmov (!%p240_p9), 0   ;;  %vm304_vm1 = vcmask (!%p240_p9), 261120  }
   0xe   : > { %243 = sbr.rel (%p240_p9) target bundleno = 758 (0x2f6), region = 48  ;;  %817 = vset.pattern.permute.xlu1 (!%p240_p9), %v901_v3  ;;  %818 = vset.pattern.permute.xlu0 (!%p240_p9), %v901_v3  ;;  %v297_v4 = vld [vmem:[%s1159_s2] sm:$0xf] (!%p240_p9)  ;;  %v902_v10 = vmov (!%p240_p9), 0.0   ;;  %s903_s22 = smov (!%p240_p9), 2   ;;  %v363_v22 = vld [vmem:[%s1161_s4 + $0x28] sm:$0xff] (!%p240_p9) }
   0xf   : > { %293 = vperm.xlu1 (!%p240_p9), %817, %v290_v2   ;;  %305 = vst.msk [vmem:[#allocation2] sm:$0xff] (!%p240_p9), %vm304_vm1, %v902_v10  ;;  %306 = vst.msk [vmem:[#allocation2 + $0x8] sm:$0xff] (!%p240_p9), %vm304_vm1, %v902_v10  ;;  %s904_s23 = smov (!%p240_p9), 3   ;;  %s905_s29 = smov (!%p240_p9), 1   ;;  %v346_v20 = vld [vmem:[%s1160_s3] sm:$0xff] (!%p240_p9)  ;;  %v364_v23 = vld [vmem:[%s1161_s4 + $0x30] sm:$0xff] (!%p240_p9) }
  0x10   : > { %307 = vst.msk [vmem:[#allocation2 + $0x10] sm:$0xff] (!%p240_p9), %vm304_vm1, %v902_v10  ;;  %308 = vst.msk [vmem:[#allocation2 + $0x18] sm:$0xff] (!%p240_p9), %vm304_vm1, %v902_v10  ;;  %s906_s8 = smov (!%p240_p9), 127   ;;  %s907_s9 = smov (!%p240_p9), 126   ;;  %v350_v21 = vld [vmem:[%s1160_s3 + $0x20] sm:$0xff] (!%p240_p9)  ;;  %743 = vmatprep.mubr.msk.f32.mxu0 (!%p240_p9), %vm304_vm1, %v346_v20  ;;  %v360_v25 = vld [vmem:[%s1161_s4 + $0x10] sm:$0xff] (!%p240_p9) }
  0x11   : > { %749 = vmatprep.mubr.msk.f32.mxu1 (!%p240_p9), %vm304_vm1, %v350_v21  ;;  %s909_s18 = smov (!%p240_p9), 124   ;;  %v358_v24 = vld [vmem:[%s1161_s4] sm:$0xff] (!%p240_p9)  ;;  %v565_v27 = vld [vmem:[%s1162_s5 + $0x10] sm:$0xff] (!%p240_p9)  ;;  %v365_v31 = vld [vmem:[%s1161_s4 + $0x38] sm:$0xff] (!%p240_p9)  ;;  %vm318_vm2 = vcmask (!%p240_p9), 257040   ;;  %vm313_vm3 = vcmask (!%p240_p9), 257048  }
  0x12   : > { %v563_v26 = vld [vmem:[%s1162_s5] sm:$0xff] (!%p240_p9)  ;;  %v593_v29 = vld [vmem:[%s1163_s6 + $0x10] sm:$0xff] (!%p240_p9)  ;;  %v359_v32 = vld [vmem:[%s1161_s4 + $0x8] sm:$0xff] (!%p240_p9)  ;;  %vm323_vm4 = vcmask (!%p240_p9), 257032   ;;  %vm329_vm5 = vcmask (!%p240_p9), 248832   ;;  %vm334_vm6 = vcmask (!%p240_p9), 240640  }
  0x13   : > { %300 = vperm.xlu1 (!%p240_p9), %817, %v297_v4   ;;  %v591_v28 = vld [vmem:[%s1163_s6] sm:$0xff] (!%p240_p9)  ;;  %v361_v33 = vld [vmem:[%s1161_s4 + $0x18] sm:$0xff] (!%p240_p9)  ;;  %v564_v34 = vld [vmem:[%s1162_s5 + $0x8] sm:$0xff] (!%p240_p9)  ;;  %vm339_vm7 = vcmask (!%p240_p9), 232448   ;;  %vm344_vm8 = vcmask (!%p240_p9), 224256   ;;  %s267_s21 = sand.u32 (!%p240_p9), 1, %s891_s25  }
  0x14   : > { %v362_v30 = vld [vmem:[%s1161_s4 + $0x20] sm:$0xff] (!%p240_p9)  ;;  %v566_v35 = vld [vmem:[%s1162_s5 + $0x18] sm:$0xff] (!%p240_p9)  ;;  %v592_v36 = vld [vmem:[%s1163_s6 + $0x8] sm:$0xff] (!%p240_p9)  ;;  %s910_s16 = smov (!%p240_p9), [#allocation3]  }
  0x15   : > { %s271_s13 = scalar_select %p270_p10, %s974_s28, 1  ;;  %v594_v37 = vld [vmem:[%s1163_s6 + $0x18] sm:$0xff]  ;;  %v347_v51 = vld [vmem:[%s1160_s3 + $0x8] sm:$0xff]  ;;  %v348_v53 = vld [vmem:[%s1160_s3 + $0x10] sm:$0xff] }
  0x16   : > { %v351_v52 = vld [vmem:[%s1160_s3 + $0x28] sm:$0xff]  ;;  %v352_v54 = vld [vmem:[%s1160_s3 + $0x30] sm:$0xff]  ;;  %v349_v55 = vld [vmem:[%s1160_s3 + $0x18] sm:$0xff] }
  0x17   : > { %s708_s14 = sshll.u32 %s271_s13, 2  ;;  %s908_s13 = smov 125   ;;  %v353_v56 = vld [vmem:[%s1160_s3 + $0x38] sm:$0xff] }
  0x18   : > { %s273_s17 = scalar_lea.vmem %s1157_s0, %s708_s14 }
  0x19   : > { %v274_v0 = vld [vmem:[%s273_s17] sm:$0xf]  ;;  %s841_s17 = sshll.u32 %s910_s16, 4  ;;  %s842_s17 = int_to_ptr.vmem [resolvable:$false] %s841_s17 }
  0x1a   : > { %v276_v1 = vsel %vm275_vm0, %v274_v0, 0.0 }
  0x1b   : > { %277 = vadd.xlane.f32.xlu0 %v276_v1 }
  0x8e   : > { %v294_v14 = vpop.permute.xlu1 %293 }
  0x92   : > { %v301_v18 = vpop.permute.xlu1 %300 }
  0xa8   : > { %v278_v5 = vpop.xlane.xlu0 %277 }
  0xa9   : > { %v280_v6 = vmul.f32 0.03125, %v278_v5 }
  0xab   : > { %v281_v7 = vsub.f32 %v274_v0, %v280_v6 }
  0xad   : > { %v282_v8 = vmul.f32 %v281_v7, %v281_v7 }
  0xaf   : > { %v283_v9 = vsel %vm275_vm0, %v282_v8, 0.0 }
  0xb0   : > { %284 = vadd.xlane.f32.xlu0 %v283_v9 }
 0x13d   : > { %v285_v11 = vpop.xlane.xlu0 %284 }
 0x13e   : > { %v286_v12 = vmul.f32 0.03125, %v285_v11 }
 0x140   : > { %v287_v13 = vadd.f32 1e-05, %v286_v12 }
 0x142   : > { %819 = vrsqrt.f32 %v287_v13 }
 0x14c   : > { %v820_v15 = vpop.eup %819 }
 0x14d   : > { %v289_v16 = vmul.f32 %v820_v15, %v281_v7 }
 0x14f   : > { %v296_v17 = vmul.f32 %v294_v14, %v289_v16 }
 0x151   : > { %v303_v19 = vadd.f32 %v301_v18, %v296_v17 }
 0x153   : > { %315 = vrot.lane.b32.xlu1 %v303_v19, %s903_s22  ;;  %310 = vrot.lane.b32.xlu0 %v303_v19, %s904_s23  ;;  %325 = vst.msk [vmem:[#allocation2 + $0xc] sm:$0xf] %vm275_vm0, %v303_v19  ;;  %s707_s22 = sshll.u32 %s267_s21, 5  ;;  %s722_s23 = sshll.u32 %s974_s28, 9 }
 0x154   : > { %s1108_s14 = scalar_lea.hbm %s1164_s7, %s722_s23  ;;  %s1116_s28 = scalar_lea.sflag [#allocation4], %s267_s21 }
 0x157   : > { %320 = vrot.lane.b32.xlu1 %v303_v19, %s905_s29  ;;  %388 = vperm.xlu0 %818, %v362_v30   ;;  %s269_s29 = scalar_lea.vmem [#allocation3], %s707_s22 }
 0x15b   : > { %326 = vrot.lane.b32.xlu1 %v303_v19, %s906_s8  ;;  %403 = vperm.xlu0 %818, %v365_v31   ;;  %s641_s8 = sshll.u32 %s269_s29, 4  ;;  %s1110_s8 = int_to_ptr.vmem [resolvable:$true] %s641_s8 }
 0x15c   : > { %s837_s15 = scalar_lea.vmem %s1110_s8, 512  ;;  %p844_p0 = scmp.lt.s32.totalorder %s1110_s8, %s842_s17 }
 0x15d   : > { %p838_p11 = scmp.ne.s32.totalorder %s1110_s8, %s837_s15 }
 0x15f   : > { %331 = vrot.lane.b32.xlu1 %v303_v19, %s907_s9  ;;  %373 = vperm.xlu0 %818, %v359_v32   ;;  %p839_p12 = pnand %p838_p11, %p991_p5 }
 0x161   : > { %p840_p13 = pneg %p839_p12 }
 0x163   : > { %336 = vrot.lane.b32.xlu1 %v303_v19, %s908_s13  ;;  %383 = vperm.xlu0 %818, %v361_v33  }
 0x167   : > { %341 = vrot.lane.b32.xlu1 %v303_v19, %s909_s18  ;;  %574 = vperm.xlu0 %818, %v564_v34   ;;  %s843_s18 = scalar_lea.vmem %s842_s17, 1024 }
 0x168   : > { %p845_p1 = scmp.lt.s32.totalorder %s843_s18, %s837_s15 }
 0x16a   : > { %p846_p2 = por %p845_p1, %p844_p0 }
 0x16b   : > { %393 = vperm.xlu1 %817, %v363_v22   ;;  %584 = vperm.xlu0 %818, %v566_v35  }
 0x16c   : > { %p847_p3 = pnand %p846_p2, %p840_p13 }
 0x16f   : > { %398 = vperm.xlu1 %817, %v364_v23   ;;  %602 = vperm.xlu0 %818, %v592_v36  }
 0x173   : > { %368 = vperm.xlu1 %817, %v358_v24   ;;  %612 = vperm.xlu0 %818, %v594_v37  }
 0x177   : > { %378 = vperm.xlu1 %817, %v360_v25  }
 0x17b   : > { %569 = vperm.xlu1 %817, %v563_v26  }
 0x17f   : > { %579 = vperm.xlu1 %817, %v565_v27  }
 0x183   : > { %597 = vperm.xlu1 %817, %v591_v28  }
 0x187   : > { %607 = vperm.xlu1 %817, %v593_v29  }
 0x1c5   : > { %v316_v38 = vpop.permute.xlu1 %315  ;;  %v311_v39 = vpop.permute.xlu0 %310 }
 0x1c6   : > { %319 = vst.msk [vmem:[#allocation2 + $0x4] sm:$0xf] %vm318_vm2, %v316_v38 }
 0x1c7   : > { %314 = vst.msk [vmem:[#allocation2] sm:$0xf] %vm313_vm3, %v311_v39 }
 0x1c9   : > { %v321_v40 = vpop.permute.xlu1 %320 }
 0x1ca   : > { %324 = vst.msk [vmem:[#allocation2 + $0x8] sm:$0xf] %vm323_vm4, %v321_v40 }
 0x1cd   : > { %v327_v41 = vpop.permute.xlu1 %326 }
 0x1ce   : > { %330 = vst.msk [vmem:[#allocation2 + $0x10] sm:$0xf] %vm329_vm5, %v327_v41  ;;  %v354_v43 = vld [vmem:[#allocation2] sm:$0xff] }
 0x1d1   : > { %v332_v42 = vpop.permute.xlu1 %331  ;;  %v355_v44 = vld [vmem:[#allocation2 + $0x8] sm:$0xff] }
 0x1d2   : > { %335 = vst.msk [vmem:[#allocation2 + $0x14] sm:$0xf] %vm334_vm6, %v332_v42  ;;  %v755_v45 = vpack.c.bf16 %v355_v44, %v354_v43 }
 0x1d4   : > { %756 = vmatprep.subr.bf16.mxu0 %v755_v45  ;;  %763 = vmatprep.subr.bf16.mxu1 %v755_v45 }
 0x1d5   : > { %v337_v46 = vpop.permute.xlu1 %336  ;;  %758 = vmatpush3.bf16.msra.mxu0 %v755_v45  ;;  %765 = vmatpush3.bf16.msra.mxu1 %v755_v45 }
 0x1d6   : > { %340 = vst.msk [vmem:[#allocation2 + $0x18] sm:$0xf] %vm339_vm7, %v337_v46  ;;  %v389_v57 = vpop.permute.xlu0 %388 }
 0x1d9   : > { %v342_v47 = vpop.permute.xlu1 %341  ;;  %v356_v48 = vld [vmem:[#allocation2 + $0x10] sm:$0xff] }
 0x1da   : > { %345 = vst.msk [vmem:[#allocation2 + $0x1c] sm:$0xf] %vm344_vm8, %v342_v47  ;;  %v404_v0 = vpop.permute.xlu0 %403 }
 0x1de   : > { %v374_v14 = vpop.permute.xlu0 %373 }
 0x1e1   : > { %v357_v49 = vld [vmem:[#allocation2 + $0x18] sm:$0xff] }
 0x1e2   : > { %v759_v50 = vpack.c.bf16 %v357_v49, %v356_v48  ;;  %v384_v19 = vpop.permute.xlu0 %383 }
 0x1e4   : > { %760 = vmatprep.subr.bf16.mxu0 %v759_v50  ;;  %764 = vmatprep.subr.bf16.mxu1 %v759_v50 }
 0x1e5   : > { %762 = vmatpush3.bf16.msra.mxu0 %v759_v50  ;;  %766 = vmatpush3.bf16.msra.mxu1 %v759_v50 }
 0x1e6   : > { %v575_v25 = vpop.permute.xlu0 %574 }
 0x1e8   : > { %744 = vmatmul.mubr.msk.f32.vlgmr.msra.gmra.mrb[0].mxu0 %vm304_vm1, %v347_v51  ;;  %750 = vmatmul.mubr.msk.f32.vlgmr.msra.gmra.mrb[0].mxu1 %vm304_vm1, %v351_v52 }
 0x1e9   : > { %746 = vmatprep.mubr.msk.f32.mxu0 %vm304_vm1, %v348_v53  ;;  %752 = vmatprep.mubr.msk.f32.mxu1 %vm304_vm1, %v352_v54 }
 0x1ea   : > { %v394_v58 = vpop.permute.xlu1 %393  ;;  %v585_v31 = vpop.permute.xlu0 %584 }
 0x1ec   : > { %747 = vmatmul.mubr.msk.f32.gmra.mrb[2].mxu0 %vm304_vm1, %v349_v55  ;;  %753 = vmatmul.mubr.msk.f32.gmra.mrb[2].mxu1 %vm304_vm1, %v353_v56 }
 0x1ee   : > { %v399_v2 = vpop.permute.xlu1 %398  ;;  %v603_v38 = vpop.permute.xlu0 %602 }
 0x1f2   : > { %v369_v16 = vpop.permute.xlu1 %368  ;;  %v613_v53 = vpop.permute.xlu0 %612 }
 0x1f6   : > { %v379_v20 = vpop.permute.xlu1 %378 }
 0x1fa   : > { %v570_v27 = vpop.permute.xlu1 %569 }
 0x1fe   : > { %v580_v32 = vpop.permute.xlu1 %579 }
 0x202   : > { %v598_v40 = vpop.permute.xlu1 %597 }
 0x206   : > { %v608_v56 = vpop.permute.xlu1 %607 }
 0x2bb   : > { %v745_v59 = vpop.f32.mrb[0].mxu0  ;;  %v751_v60 = vpop.f32.mrb[0].mxu1 }
 0x2bc   : > { %v522_v61 = vadd.f32 %v751_v60, %v394_v58  ;;  %v496_v62 = vpop.f32.mrb[1].mxu0  ;;  %v516_v63 = vpop.f32.mrb[1].mxu1  ;;  %v502_v33 = vadd.f32 %v745_v59, %v374_v14 }
 0x2bd   : > { %v517_v1 = vadd.f32 %v516_v63, %v389_v57  ;;  %v497_v35 = vadd.f32 %v496_v62, %v369_v16 }
 0x2be   : > { %v536_v3 = vsub.f32 0.0, %v522_v61 }
 0x2bf   : > { %v535_v4 = vsub.f32 0.0, %v517_v1  ;;  %v748_v5 = vpop.f32.mrb[2].mxu0  ;;  %v754_v6 = vpop.f32.mrb[2].mxu1 }
 0x2c0   : > { %v541_v7 = vmul.f32 1.442695, %v536_v3  ;;  %v532_v8 = vadd.f32 %v754_v6, %v404_v0  ;;  %v506_v9 = vpop.f32.mrb[3].mxu0  ;;  %v526_v10 = vpop.f32.mrb[3].mxu1  ;;  %v512_v42 = vadd.f32 %v748_v5, %v384_v19 }
 0x2c1   : > { %v539_v11 = vmul.f32 1.442695, %v535_v4  ;;  %v527_v12 = vadd.f32 %v526_v10, %v399_v2  ;;  %v507_v45 = vadd.f32 %v506_v9, %v379_v20 }
 0x2c2   : > { %821 = vpow2.f32 %v541_v7  ;;  %v538_v13 = vsub.f32 0.0, %v532_v8 }
 0x2c3   : > { %823 = vpow2.f32 %v539_v11  ;;  %v537_v15 = vsub.f32 0.0, %v527_v12 }
 0x2c4   : > { %v545_v17 = vmul.f32 1.442695, %v538_v13 }
 0x2c5   : > { %v543_v18 = vmul.f32 1.442695, %v537_v15 }
 0x2c6   : > { %825 = vpow2.f32 %v545_v17 }
 0x2c7   : > { %827 = vpow2.f32 %v543_v18 }
 0x2cc   : > { %v822_v21 = vpop.eup %821 }
 0x2cd   : > { %v824_v22 = vpop.eup %823  ;;  %v548_v23 = vadd.f32 1.0, %v822_v21 }
 0x2ce   : > { %v547_v24 = vadd.f32 1.0, %v824_v22 }
 0x2cf   : > { %829 = vrcp.f32 %v548_v23 }
 0x2d0   : > { %v826_v26 = vpop.eup %825  ;;  %831 = vrcp.f32 %v547_v24 }
 0x2d1   : > { %v828_v28 = vpop.eup %827  ;;  %v550_v29 = vadd.f32 1.0, %v826_v26 }
 0x2d2   : > { %v549_v30 = vadd.f32 1.0, %v828_v28 }
 0x2d3   : > { %833 = vrcp.f32 %v550_v29 }
 0x2d4   : > { %835 = vrcp.f32 %v549_v30 }
 0x2d9   : > { %v830_v34 = vpop.eup %829 }
 0x2da   : > { %v832_v36 = vpop.eup %831  ;;  %v560_v37 = vmul.f32 %v830_v34, %v502_v33 }
 0x2db   : > { %v559_v39 = vmul.f32 %v832_v36, %v497_v35 }
 0x2dc   : > { %v588_v41 = vmul.f32 %v575_v25, %v560_v37 }
 0x2dd   : > { %v834_v43 = vpop.eup %833  ;;  %v587_v44 = vmul.f32 %v570_v27, %v559_v39 }
 0x2de   : > { %v836_v46 = vpop.eup %835  ;;  %v616_v47 = vadd.f32 %v603_v38, %v588_v41  ;;  %v562_v48 = vmul.f32 %v834_v43, %v512_v42 }
 0x2df   : > { %v615_v49 = vadd.f32 %v598_v40, %v587_v44  ;;  %v561_v50 = vmul.f32 %v836_v46, %v507_v45 }
 0x2e0   : > { %v620_v51 = vmax.f32 %v616_v47, 0.0  ;;  %v590_v52 = vmul.f32 %v585_v31, %v562_v48 }
 0x2e1   : > { %v619_v54 = vmax.f32 %v615_v49, 0.0  ;;  %v589_v55 = vmul.f32 %v580_v32, %v561_v50 }
 0x2e2   : > { %v618_v57 = vadd.f32 %v613_v53, %v590_v52  ;;  %624 = vst.msk [vmem:[%s269_s29 + $0x8] sm:$0xff] %vm304_vm1, %v620_v51 }
 0x2e3   : > { %v617_v58 = vadd.f32 %v608_v56, %v589_v55  ;;  %623 = vst.msk [vmem:[%s269_s29] sm:$0xff] %vm304_vm1, %v619_v54 }
 0x2e4   : > { %v622_v59 = vmax.f32 %v618_v57, 0.0 }
 0x2e5   : > { %v621_v60 = vmax.f32 %v617_v58, 0.0 }
 0x2e6   : > { %626 = vst.msk [vmem:[%s269_s29 + $0x18] sm:$0xff] %vm304_vm1, %v622_v59 }
 0x2e7   : > { %625 = vst.msk [vmem:[%s269_s29 + $0x10] sm:$0xff] %vm304_vm1, %v621_v60 }
 0x2e8   : > { %850 = shalt.err (!%p847_p3)
}
 0x2e9   : > { %s851_s19 = scalar_lea.hbm %s1108_s14, 512  ;;  %s855_s22 = scalar_lea.hbm %s1164_s7, 1024 }
 0x2ea   : > { %p852_p4 = scmp.ne.s32.totalorder %s1108_s14, %s851_s19  ;;  %p856_p9 = scmp.lt.u32.totalorder %s1108_s14, %s1164_s7 }
 0x2eb   : > { %p857_p10 = scmp.lt.u32.totalorder %s855_s22, %s851_s19  ;;  %p859_p12 = scmp.lt.u32.totalorder %s851_s19, %s1108_s14 }
 0x2ec   : > { %p853_p7 = pnand %p852_p4, %p991_p5 }
 0x2ed   : > { %p858_p11 = por %p857_p10, %p856_p9 }
 0x2ee   : > { %p854_p8 = pneg %p853_p7 }
 0x2ef   : > { %p860_p13 = por %p859_p12, %p858_p11 }
 0x2f1   : > { %p861_p0 = pnand %p860_p13, %p854_p8 }
 0x2f3   : > { %864 = shalt.err (!%p861_p0)
}
 0x2f4   : > { %s911_s9 = smov 128   ;;  %s912_s13 = smov 8  }
 0x2f5   : > { %767 = dma.vmem_to_hbm [thread:$0]  (%p991_p5), %s1110_s8, 512, %s1108_s14, %s1116_s28, %s911_s9, %s911_s9, %s912_s13  }
 0x2f6 PF: > { %p773_p1 = scmp.ge.s32.totalorder %s899_s27, 2  ;;  %s656_s15 = sand.u32 1, %s887_s24  }
 0x2f7   : > { %s657_s16 = scalar_lea.sflag [#allocation4], %s656_s15 }
 0x2f8   : > { %p770_p2 = pnand %p773_p1, %p995_p6 }
 0x2fa   : > { %882 = dma.done.wait (!%p770_p2), %s657_s16, 512  }
 0x2fb   : > { %884 = vsyncadd (!%p770_p2), %s657_s16, 4294966784  ;;  %p17_p3 = scmp.ge.s32.totalorder %s978_s30, 4   ;;  %s1167_s24 = smov %s891_s25 }
 0x2fc   : > { %s1168_s25 = smov %s895_s26  ;;  %s1169_s26 = smov %s989_s10 }
 0x2fd   : > { %s1170_s27 = smov %s978_s30  ;;  %19 = sbr.rel (!%p17_p3) target bundleno = 3 (0x3), region = 83 }
 0x304   :  { %662 = vsyncpa [#allocation4], 1 }
 0x305   :  { %664 = vsyncpa [#allocation4 + $0x1], 1 }

</bundles_post_ra>
